<compile_context>
chip_gen: v6e
topology: v6e:2x2x1
jax: 0.10.0
libtpu: 0.0.40
codegen_flags: <defaults>
</compile_context>

<pallas_src>
import functools

import jax
import jax.numpy as jnp
from jax.experimental import pallas as pl
from jax.experimental.pallas import tpu as pltpu

LN_EPS = 1e-5  # torch.nn.LayerNorm default


def _round_up(x, m):
    return ((x + m - 1) // m) * m


def _vmem_capacity_bytes():
    try:
        info = pltpu.get_tpu_info()
        cap = getattr(info, "vmem_capacity_bytes", None)
        if cap:
            return int(cap)
    except Exception:
        pass
    return 64 * 1024 * 1024  # conservative (v7x per-TensorCore)


def _layernorm_rows(y, g, beta, e_real, out_dtype):
    """Single-pass LayerNorm over the last axis; padded lanes of y are exactly zero."""
    inv_e = jnp.float32(1.0 / e_real)
    mean = jnp.sum(y, axis=-1, keepdims=True) * inv_e
    var = jnp.sum(y * y, axis=-1, keepdims=True) * inv_e - mean * mean
    var = jnp.maximum(var, 0.0)  # guard tiny negative from cancellation
    scale = jax.lax.rsqrt(var + LN_EPS)
    return ((y - mean) * (scale * g) + beta).astype(out_dtype)


def _add_norm_resident_kernel(x_ref, w_ref, b_ref, g_ref, beta_ref, o_ref, *, e_real):
    # Linear: y = x @ W^T + b, with W in torch (out, in) layout (contract both last dims).
    y = jax.lax.dot_general(
        x_ref[...], w_ref[...],
        dimension_numbers=(((1,), (1,)), ((), ())),
        preferred_element_type=jnp.float32)
    y = y + b_ref[...]
    # Dropout(p=0.1): identity in eval/inference mode.
    # TODO(synk): training-mode dropout (stochastic mask via pltpu.prng_random_bits) not emitted.
    o_ref[...] = _layernorm_rows(y, g_ref[...], beta_ref[...], e_real, o_ref.dtype)


def _add_norm_ktiled_kernel(x_ref, w_ref, b_ref, g_ref, beta_ref, o_ref, acc_ref, *, e_real):
    k = pl.program_id(1)

    @pl.when(k == 0)
    def _():
        acc_ref[...] = jnp.zeros_like(acc_ref)

    acc_ref[...] += jax.lax.dot_general(
        x_ref[...], w_ref[...],
        dimension_numbers=(((1,), (1,)), ((), ())),
        preferred_element_type=jnp.float32)

    @pl.when(k == pl.num_programs(1) - 1)
    def _():
        y = acc_ref[...] + b_ref[...]
        o_ref[...] = _layernorm_rows(y, g_ref[...], beta_ref[...], e_real, o_ref.dtype)


def add_norm(batch_x, weight, bias, gamma, beta, *,
             tile_m=512, tile_k=512, mxu_dtype=jnp.bfloat16, force_k_tiling=False):
    """batch_x: (B, S, E). weight: (E, E) torch-style (out, in). bias/gamma/beta: (E,)."""
    B, S, E = batch_x.shape
    M = B * S
    out_dtype = batch_x.dtype
    out_itemsize = jnp.dtype(out_dtype).itemsize
    mxu_dtype = jnp.dtype(mxu_dtype)
    itemsize = mxu_dtype.itemsize

    # Pad the embedding (lane) axis only when it is not already 128-aligned.
    E_pad = E if E % 128 == 0 else _round_up(E, 128)

    x2d = batch_x.reshape(M, E)
    w, b1, g1, be1 = weight, bias, gamma, beta
    if E_pad != E:
        pe = E_pad - E
        x2d = jnp.pad(x2d, ((0, 0), (0, pe)))
        w = jnp.pad(w, ((0, pe), (0, pe)))
        b1 = jnp.pad(b1, (0, pe))
        g1 = jnp.pad(g1, (0, pe))
        be1 = jnp.pad(be1, (0, pe))
    x2d = x2d.astype(mxu_dtype)
    w = w.astype(mxu_dtype)                               # torch (out, in) layout, no transpose pass
    b2d = b1.reshape(1, E_pad).astype(jnp.float32)
    g2d = g1.reshape(1, E_pad).astype(jnp.float32)
    beta2d = be1.reshape(1, E_pad).astype(jnp.float32)

    vmem_budget = int(0.75 * _vmem_capacity_bytes())

    # Row tile: multiple of the sublane packing of the MXU dtype, never larger than the problem.
    row_align = 16 if itemsize < 4 else 8
    tile_m = max(row_align, min(int(tile_m), _round_up(M, row_align)))
    tile_m = _round_up(tile_m, row_align)

    weight_bytes = E_pad * E_pad * itemsize
    use_k_tiling = force_k_tiling or (weight_bytes > vmem_budget // 3)

    if not use_k_tiling:
        def vmem_use(tm):
            return (weight_bytes                        # W, single-buffered
                    + 2 * tm * E_pad * itemsize         # x, double-buffered
                    + 2 * tm * E_pad * out_itemsize     # out, double-buffered
                    + 3 * tm * E_pad * 4                # f32 y / temporaries headroom
                    + 3 * 2 * E_pad * 4)
        while tile_m > row_align and vmem_use(tile_m) > vmem_budget:
            tile_m = max(row_align, _round_up(tile_m // 2, row_align))
        tile_k = E_pad  # unused, full contraction per step
    else:
        tile_k = min(int(tile_k), E_pad)
        tile_k = max(128, (tile_k // 128) * 128)
        while E_pad % tile_k != 0:
            tile_k -= 128

        def vmem_use(tm):
            return (2 * E_pad * tile_k * itemsize       # W blocks, double-buffered
                    + 2 * tm * tile_k * itemsize        # x blocks, double-buffered
                    + 2 * tm * E_pad * out_itemsize     # out blocks, double-buffered
                    + tm * E_pad * 4                    # f32 accumulator scratch
                    + 2 * tm * E_pad * 4                # f32 finalize temporaries
                    + 3 * 2 * E_pad * 4)
        while tile_m > row_align and vmem_use(tile_m) > vmem_budget:
            tile_m = max(row_align, _round_up(tile_m // 2, row_align))

    def build_call(single_buffer):
        def const_spec(shape):
            if single_buffer:
                return pl.BlockSpec(shape, lambda *idx: (0,) * len(shape),
                                    pipeline_mode=pl.Buffered(1))
            return pl.BlockSpec(shape, lambda *idx: (0,) * len(shape))

        if not use_k_tiling:
            kernel = functools.partial(_add_norm_resident_kernel, e_real=E)
            grid = (pl.cdiv(M, tile_m),)                 # partial last row block is fine (row-wise LN)
            in_specs = [
                pl.BlockSpec((tile_m, E_pad), lambda i: (i, 0)),     # x rows
                const_spec((E_pad, E_pad)),                          # W (resident, single-buffered)
                const_spec((1, E_pad)),                              # bias
                const_spec((1, E_pad)),                              # LN gamma
                const_spec((1, E_pad)),                              # LN beta
            ]
            out_specs = pl.BlockSpec((tile_m, E_pad), lambda i: (i, 0))
            scratch = []
            dims = ("parallel",)
        else:
            kernel = functools.partial(_add_norm_ktiled_kernel, e_real=E)
            grid = (pl.cdiv(M, tile_m), E_pad // tile_k)
            in_specs = [
                pl.BlockSpec((tile_m, tile_k), lambda i, k: (i, k)),  # x rows, K-chunk
                pl.BlockSpec((E_pad, tile_k), lambda i, k: (0, k)),   # W K-chunk (torch layout)
                const_spec((1, E_pad)),
                const_spec((1, E_pad)),
                const_spec((1, E_pad)),
            ]
            out_specs = pl.BlockSpec((tile_m, E_pad), lambda i, k: (i, 0))
            scratch = [pltpu.VMEM((tile_m, E_pad), jnp.float32)]
            dims = ("parallel", "arbitrary")

        cost = pl.CostEstimate(
            flops=2 * M * E_pad * E_pad,
            transcendentals=0,
            bytes_accessed=(M * E_pad * (itemsize + out_itemsize)
                            + E_pad * E_pad * itemsize
                            + 3 * E_pad * 4),
        )
        return pl.pallas_call(
            kernel,
            out_shape=jax.ShapeDtypeStruct((M, E_pad), out_dtype),
            grid_spec=pltpu.PrefetchScalarGridSpec(
                num_scalar_prefetch=0,
                grid=grid,
                in_specs=in_specs,
                out_specs=out_specs,
                scratch_shapes=scratch,
            ),
            compiler_params=pltpu.CompilerParams(
                dimension_semantics=dims,          # row axis shards across v7x's 2 TCs
                vmem_limit_bytes=vmem_budget,
            ),
            cost_estimate=cost,
        )

    try:
        out2d = build_call(single_buffer=True)(x2d, w, b2d, g2d, beta2d)
    except Exception:
        # pipeline_mode=pl.Buffered(1) not supported on this jax build -> default buffering.
        out2d = build_call(single_buffer=False)(x2d, w, b2d, g2d, beta2d)

    if E_pad != E:
        out2d = out2d[:, :E]
    return out2d.reshape(B, S, E)


def add_norm_ref(batch_x, weight, bias, gamma, beta):
    y = jnp.einsum("bse,oe->bso", batch_x, weight) + bias
    mean = jnp.mean(y, axis=-1, keepdims=True)
    var = jnp.mean((y - mean) ** 2, axis=-1, keepdims=True)
    return (y - mean) / jnp.sqrt(var + LN_EPS) * gamma + beta


if __name__ == "__main__":
    B, S, E = 2, 8, 32
    key = jax.random.PRNGKey(0)
    kx, kw, kb = jax.random.split(key, 3)

    batch_x = jax.random.normal(kx, (B, S, E), dtype=jnp.float32)
    bound = 1.0 / (E ** 0.5)
    weight = jax.random.uniform(kw, (E, E), minval=-bound, maxval=bound, dtype=jnp.float32)
    bias = jax.random.uniform(kb, (E,), minval=-bound, maxval=bound, dtype=jnp.float32)
    gamma = jnp.ones((E,), dtype=jnp.float32)
    beta = jnp.zeros((E,), dtype=jnp.float32)

    ref = add_norm_ref(batch_x, weight, bias, gamma, beta)

    # Exact f32 MXU path, tight tolerance.
    out_f32 = jax.block_until_ready(
        add_norm(batch_x, weight, bias, gamma, beta, mxu_dtype=jnp.float32))
    assert out_f32.shape == (B, S, E)
    assert jnp.allclose(out_f32, ref, atol=1e-4, rtol=1e-4), "f32 path mismatch vs reference"

    # Default bf16 MXU path (f32 accumulation); tolerance reflects bf16 operand rounding.
    out_bf16 = jax.block_until_ready(add_norm(batch_x, weight, bias, gamma, beta))
    assert jnp.allclose(out_bf16, ref, atol=5e-2, rtol=5e-2), "bf16 path mismatch vs reference"

    # K-tiled accumulator path (auto-selected for large E; forced here at a small shape).
    B2, S2, E2 = 2, 8, 256
    x2 = jax.random.normal(kx, (B2, S2, E2), dtype=jnp.float32)
    bound2 = 1.0 / (E2 ** 0.5)
    w2 = jax.random.uniform(kw, (E2, E2), minval=-bound2, maxval=bound2, dtype=jnp.float32)
    b2 = jax.random.uniform(kb, (E2,), minval=-bound2, maxval=bound2, dtype=jnp.float32)
    g2 = jnp.ones((E2,), dtype=jnp.float32)
    be2 = jnp.zeros((E2,), dtype=jnp.float32)
    ref2 = add_norm_ref(x2, w2, b2, g2, be2)
    out2 = jax.block_until_ready(
        add_norm(x2, w2, b2, g2, be2, tile_k=128, force_k_tiling=True))
    assert jnp.allclose(out2, ref2, atol=5e-2, rtol=5e-2), "K-tiled path mismatch vs reference"

    print("KERNEL_OK")
</pallas_src>

<mosaic_0001>
module attributes {stable_mosaic.version = 11 : i64} {
  func.func @_add_norm_resident_kernel(%arg0: i32, %arg1: memref<16x128xf32, #tpu.memory_space<vmem>>, %arg2: memref<128x128xf32, #tpu.memory_space<vmem>>, %arg3: memref<1x128xf32, #tpu.memory_space<vmem>>, %arg4: memref<1x128xf32, #tpu.memory_space<vmem>>, %arg5: memref<1x128xf32, #tpu.memory_space<vmem>>, %arg6: memref<16x128xf32, #tpu.memory_space<vmem>>) attributes {dimension_semantics = [#tpu.dimension_semantics<parallel>], iteration_bounds = array<i64: 1>, scalar_prefetch = 0 : i64, scratch_operands = 0 : i64, tpu.core_type = #tpu.core_type<tc>, window_params = [{transform_indices = @transform_0, window_bounds = array<i64: 16, 128>}, {pipeline_mode = #tpu.pipeline_mode<synchronous>, transform_indices = @transform_1, window_bounds = array<i64: 128, 128>}, {pipeline_mode = #tpu.pipeline_mode<synchronous>, transform_indices = @transform_2, window_bounds = array<i64: 1, 128>}, {pipeline_mode = #tpu.pipeline_mode<synchronous>, transform_indices = @transform_3, window_bounds = array<i64: 1, 128>}, {pipeline_mode = #tpu.pipeline_mode<synchronous>, transform_indices = @transform_4, window_bounds = array<i64: 1, 128>}, {transform_indices = @transform_5, window_bounds = array<i64: 16, 128>}]} {
    %c0 = arith.constant 0 : index
    %c0_0 = arith.constant 0 : index
    %0 = vector.load %arg1[%c0, %c0_0] : memref<16x128xf32, #tpu.memory_space<vmem>>, vector<16x128xf32>
    %c0_1 = arith.constant 0 : index
    %c0_2 = arith.constant 0 : index
    %1 = vector.load %arg2[%c0_1, %c0_2] : memref<128x128xf32, #tpu.memory_space<vmem>>, vector<128x128xf32>
    %cst = arith.constant dense<0.000000e+00> : vector<16x128xf32>
    %2 = tpu.matmul %0, %1, %cst {dimension_numbers = #tpu.dot_dimension_numbers<[1], [1], [0], [0], [0, 0, 1, 0], [], []>} : vector<16x128xf32>, vector<128x128xf32>, vector<16x128xf32> -> vector<16x128xf32>
    %c0_3 = arith.constant 0 : index
    %c0_4 = arith.constant 0 : index
    %3 = vector.load %arg3[%c0_3, %c0_4] : memref<1x128xf32, #tpu.memory_space<vmem>>, vector<1x128xf32>
    %4 = vector.broadcast %3 : vector<1x128xf32> to vector<16x128xf32>
    %5 = arith.addf %2, %4 : vector<16x128xf32>
    %c0_5 = arith.constant 0 : index
    %c0_6 = arith.constant 0 : index
    %6 = vector.load %arg4[%c0_5, %c0_6] : memref<1x128xf32, #tpu.memory_space<vmem>>, vector<1x128xf32>
    %c0_7 = arith.constant 0 : index
    %c0_8 = arith.constant 0 : index
    %7 = vector.load %arg5[%c0_7, %c0_8] : memref<1x128xf32, #tpu.memory_space<vmem>>, vector<1x128xf32>
    %cst_9 = arith.constant dense<0.000000e+00> : vector<16xf32>
    %8 = vector.multi_reduction <add>, %5, %cst_9 [1] : vector<16x128xf32> to vector<16xf32>
    %9 = vector.shape_cast %8 : vector<16xf32> to vector<16x1xf32>
    %cst_10 = arith.constant 3.125000e-02 : f32
    %10 = vector.broadcast %cst_10 : f32 to vector<16x1xf32>
    %11 = arith.mulf %9, %10 : vector<16x1xf32>
    %12 = arith.mulf %5, %5 : vector<16x128xf32>
    %cst_11 = arith.constant dense<0.000000e+00> : vector<16xf32>
    %13 = vector.multi_reduction <add>, %12, %cst_11 [1] : vector<16x128xf32> to vector<16xf32>
    %14 = vector.shape_cast %13 : vector<16xf32> to vector<16x1xf32>
    %cst_12 = arith.constant 3.125000e-02 : f32
    %15 = vector.broadcast %cst_12 : f32 to vector<16x1xf32>
    %16 = arith.mulf %14, %15 : vector<16x1xf32>
    %17 = arith.mulf %11, %11 : vector<16x1xf32>
    %18 = arith.subf %16, %17 : vector<16x1xf32>
    %cst_13 = arith.constant 0.000000e+00 : f32
    %19 = vector.broadcast %cst_13 : f32 to vector<16x1xf32>
    %20 = arith.maximumf %18, %19 : vector<16x1xf32>
    %cst_14 = arith.constant 9.99999974E-6 : f32
    %21 = vector.broadcast %cst_14 : f32 to vector<16x1xf32>
    %22 = arith.addf %20, %21 : vector<16x1xf32>
    %23 = math.rsqrt %22 : vector<16x1xf32>
    %24 = vector.broadcast %11 : vector<16x1xf32> to vector<16x128xf32>
    %25 = arith.subf %5, %24 : vector<16x128xf32>
    %26 = vector.broadcast %23 : vector<16x1xf32> to vector<16x128xf32>
    %27 = vector.broadcast %6 : vector<1x128xf32> to vector<16x128xf32>
    %28 = arith.mulf %26, %27 : vector<16x128xf32>
    %29 = arith.mulf %25, %28 : vector<16x128xf32>
    %30 = vector.broadcast %7 : vector<1x128xf32> to vector<16x128xf32>
    %31 = arith.addf %29, %30 : vector<16x128xf32>
    %c0_15 = arith.constant 0 : index
    %c0_16 = arith.constant 0 : index
    %32 = vector.load %arg6[%c0_15, %c0_16] : memref<16x128xf32, #tpu.memory_space<vmem>>, vector<16x128xf32>
    tpu.vector_store %arg6[%c0_15, %c0_16], %31 {strides = array<i32>} : memref<16x128xf32, #tpu.memory_space<vmem>>, vector<16x128xf32>,
    return
  }
  func.func @transform_0(%arg0: i32) -> (i32, i32) {
    %c0_i32 = arith.constant 0 : i32
    %c0_i32_0 = arith.constant 0 : i32
    return %arg0, %c0_i32 : i32, i32
  }
  func.func @transform_1(%arg0: i32) -> (i32, i32) {
    %c0_i32 = arith.constant 0 : i32
    %c0_i32_0 = arith.constant 0 : i32
    %c0_i32_1 = arith.constant 0 : i32
    return %c0_i32, %c0_i32_0 : i32, i32
  }
  func.func @transform_2(%arg0: i32) -> (i32, i32) {
    %c0_i32 = arith.constant 0 : i32
    %c0_i32_0 = arith.constant 0 : i32
    %c0_i32_1 = arith.constant 0 : i32
    return %c0_i32, %c0_i32_0 : i32, i32
  }
  func.func @transform_3(%arg0: i32) -> (i32, i32) {
    %c0_i32 = arith.constant 0 : i32
    %c0_i32_0 = arith.constant 0 : i32
    %c0_i32_1 = arith.constant 0 : i32
    return %c0_i32, %c0_i32_0 : i32, i32
  }
  func.func @transform_4(%arg0: i32) -> (i32, i32) {
    %c0_i32 = arith.constant 0 : i32
    %c0_i32_0 = arith.constant 0 : i32
    %c0_i32_1 = arith.constant 0 : i32
    return %c0_i32, %c0_i32_0 : i32, i32
  }
  func.func @transform_5(%arg0: i32) -> (i32, i32) {
    %c0_i32 = arith.constant 0 : i32
    %c0_i32_0 = arith.constant 0 : i32
    return %arg0, %c0_i32 : i32, i32
  }
}

module attributes {stable_mosaic.version = 11 : i64} {
  func.func @_add_norm_resident_kernel(%arg0: i32, %arg1: memref<16x128xf32, #tpu.memory_space<vmem>>, %arg2: memref<128x128xf32, #tpu.memory_space<vmem>>, %arg3: memref<1x128xf32, #tpu.memory_space<vmem>>, %arg4: memref<1x128xf32, #tpu.memory_space<vmem>>, %arg5: memref<1x128xf32, #tpu.memory_space<vmem>>, %arg6: memref<16x128xf32, #tpu.memory_space<vmem>>) attributes {dimension_semantics = [#tpu.dimension_semantics<parallel>], iteration_bounds = array<i64: 1>, scalar_prefetch = 0 : i64, scratch_operands = 0 : i64, tpu.core_type = #tpu.core_type<tc>, window_params = [{transform_indices = @transform_0, window_bounds = array<i64: 16, 128>}, {pipeline_mode = #tpu.pipeline_mode<synchronous>, transform_indices = @transform_1, window_bounds = array<i64: 128, 128>}, {pipeline_mode = #tpu.pipeline_mode<synchronous>, transform_indices = @transform_2, window_bounds = array<i64: 1, 128>}, {pipeline_mode = #tpu.pipeline_mode<synchronous>, transform_indices = @transform_3, window_bounds = array<i64: 1, 128>}, {pipeline_mode = #tpu.pipeline_mode<synchronous>, transform_indices = @transform_4, window_bounds = array<i64: 1, 128>}, {transform_indices = @transform_5, window_bounds = array<i64: 16, 128>}]} {
    %c0 = arith.constant 0 : index
    %c0_0 = arith.constant 0 : index
    %0 = vector.load %arg1[%c0, %c0_0] : memref<16x128xf32, #tpu.memory_space<vmem>>, vector<16x128xf32>
    %c0_1 = arith.constant 0 : index
    %c0_2 = arith.constant 0 : index
    %1 = vector.load %arg2[%c0_1, %c0_2] : memref<128x128xf32, #tpu.memory_space<vmem>>, vector<128x128xf32>
    %cst = arith.constant dense<0.000000e+00> : vector<16x128xf32>
    %2 = tpu.matmul %0, %1, %cst {dimension_numbers = #tpu.dot_dimension_numbers<[1], [1], [0], [0], [0, 0, 1, 0], [], []>} : vector<16x128xf32>, vector<128x128xf32>, vector<16x128xf32> -> vector<16x128xf32>
    %c0_3 = arith.constant 0 : index
    %c0_4 = arith.constant 0 : index
    %3 = vector.load %arg3[%c0_3, %c0_4] : memref<1x128xf32, #tpu.memory_space<vmem>>, vector<1x128xf32>
    %4 = vector.broadcast %3 : vector<1x128xf32> to vector<16x128xf32>
    %5 = arith.addf %2, %4 : vector<16x128xf32>
    %c0_5 = arith.constant 0 : index
    %c0_6 = arith.constant 0 : index
    %6 = vector.load %arg4[%c0_5, %c0_6] : memref<1x128xf32, #tpu.memory_space<vmem>>, vector<1x128xf32>
    %c0_7 = arith.constant 0 : index
    %c0_8 = arith.constant 0 : index
    %7 = vector.load %arg5[%c0_7, %c0_8] : memref<1x128xf32, #tpu.memory_space<vmem>>, vector<1x128xf32>
    %cst_9 = arith.constant dense<0.000000e+00> : vector<16xf32>
    %8 = vector.multi_reduction <add>, %5, %cst_9 [1] : vector<16x128xf32> to vector<16xf32>
    %9 = vector.shape_cast %8 : vector<16xf32> to vector<16x1xf32>
    %cst_10 = arith.constant 3.125000e-02 : f32
    %10 = vector.broadcast %cst_10 : f32 to vector<16x1xf32>
    %11 = arith.mulf %9, %10 : vector<16x1xf32>
    %12 = arith.mulf %5, %5 : vector<16x128xf32>
    %cst_11 = arith.constant dense<0.000000e+00> : vector<16xf32>
    %13 = vector.multi_reduction <add>, %12, %cst_11 [1] : vector<16x128xf32> to vector<16xf32>
    %14 = vector.shape_cast %13 : vector<16xf32> to vector<16x1xf32>
    %cst_12 = arith.constant 3.125000e-02 : f32
    %15 = vector.broadcast %cst_12 : f32 to vector<16x1xf32>
    %16 = arith.mulf %14, %15 : vector<16x1xf32>
    %17 = arith.mulf %11, %11 : vector<16x1xf32>
    %18 = arith.subf %16, %17 : vector<16x1xf32>
    %cst_13 = arith.constant 0.000000e+00 : f32
    %19 = vector.broadcast %cst_13 : f32 to vector<16x1xf32>
    %20 = arith.maximumf %18, %19 : vector<16x1xf32>
    %cst_14 = arith.constant 9.99999974E-6 : f32
    %21 = vector.broadcast %cst_14 : f32 to vector<16x1xf32>
    %22 = arith.addf %20, %21 : vector<16x1xf32>
    %23 = math.rsqrt %22 : vector<16x1xf32>
    %24 = vector.broadcast %11 : vector<16x1xf32> to vector<16x128xf32>
    %25 = arith.subf %5, %24 : vector<16x128xf32>
    %26 = vector.broadcast %23 : vector<16x1xf32> to vector<16x128xf32>
    %27 = vector.broadcast %6 : vector<1x128xf32> to vector<16x128xf32>
    %28 = arith.mulf %26, %27 : vector<16x128xf32>
    %29 = arith.mulf %25, %28 : vector<16x128xf32>
    %30 = vector.broadcast %7 : vector<1x128xf32> to vector<16x128xf32>
    %31 = arith.addf %29, %30 : vector<16x128xf32>
    %c0_15 = arith.constant 0 : index
    %c0_16 = arith.constant 0 : index
    %32 = vector.load %arg6[%c0_15, %c0_16] : memref<16x128xf32, #tpu.memory_space<vmem>>, vector<16x128xf32>
    tpu.vector_store %arg6[%c0_15, %c0_16], %31 {strides = array<i32>} : memref<16x128xf32, #tpu.memory_space<vmem>>, vector<16x128xf32>,
    return
  }
  func.func @transform_0(%arg0: i32) -> (i32, i32) {
    %c0_i32 = arith.constant 0 : i32
    %c0_i32_0 = arith.constant 0 : i32
    return %arg0, %c0_i32 : i32, i32
  }
  func.func @transform_1(%arg0: i32) -> (i32, i32) {
    %c0_i32 = arith.constant 0 : i32
    %c0_i32_0 = arith.constant 0 : i32
    %c0_i32_1 = arith.constant 0 : i32
    return %c0_i32, %c0_i32_0 : i32, i32
  }
  func.func @transform_2(%arg0: i32) -> (i32, i32) {
    %c0_i32 = arith.constant 0 : i32
    %c0_i32_0 = arith.constant 0 : i32
    %c0_i32_1 = arith.constant 0 : i32
    return %c0_i32, %c0_i32_0 : i32, i32
  }
  func.func @transform_3(%arg0: i32) -> (i32, i32) {
    %c0_i32 = arith.constant 0 : i32
    %c0_i32_0 = arith.constant 0 : i32
    %c0_i32_1 = arith.constant 0 : i32
    return %c0_i32, %c0_i32_0 : i32, i32
  }
  func.func @transform_4(%arg0: i32) -> (i32, i32) {
    %c0_i32 = arith.constant 0 : i32
    %c0_i32_0 = arith.constant 0 : i32
    %c0_i32_1 = arith.constant 0 : i32
    return %c0_i32, %c0_i32_0 : i32, i32
  }
  func.func @transform_5(%arg0: i32) -> (i32, i32) {
    %c0_i32 = arith.constant 0 : i32
    %c0_i32_0 = arith.constant 0 : i32
    return %arg0, %c0_i32 : i32, i32
  }
}

</mosaic_0001>

<bundles_post_ra>
// kernel: tpu_custom_call.1
= control target key start
LH: loop header
LB: loop body
LE: loop exit
PB: predicated region body
PF: predicated region fallthrough
CT: control target
= control target key end

     0   :  { %10 = vsyncpa [#allocation3], 0  ;;  %s408_s0 = inlined_call_operand.hbm [shape: f32[16,128], index: 0, kind: input, shape index: {}]   ;;  %s409_s1 = inlined_call_operand.hbm [shape: f32[128,128], index: 1, kind: input, shape index: {}]   ;;  %s410_s2 = inlined_call_operand.vmem [shape: f32[1,128], index: 2, kind: input, shape index: {}]   ;;  %s411_s3 = inlined_call_operand.vmem [shape: f32[1,128], index: 3, kind: input, shape index: {}]   ;;  %s412_s4 = inlined_call_operand.vmem [shape: f32[1,128], index: 4, kind: input, shape index: {}]   ;;  %s413_s5 = inlined_call_operand.hbm [shape: f32[16,128], index: 5, kind: output, shape index: {}]  }
   0x1   :  { %11 = vsyncpa [#allocation6], 0 }
   0x2   :  { %12 = vsyncpa [#allocation4], 0  ;;  %s346_s18 = smov [#allocation2]  }
   0x3   :  { %s18_s19 = sshll.u32 %s346_s18, 4  ;;  %s19_s19 = int_to_ptr.vmem [resolvable:$true] %s18_s19 }
   0x4   :  { %s288_s20 = scalar_lea.vmem %s19_s19, 256  ;;  %p293_p1 = scmp.lt.s32.totalorder %s19_s19, %s19_s19 }
   0x5   :  { %p289_p0 = scmp.ne.s32.totalorder %s19_s19, %s288_s20  ;;  %p294_p2 = scmp.lt.s32.totalorder %s288_s20, %s288_s20 }
   0x7   :  { %p295_p3 = por %p294_p2, %p293_p1 }
   0x9   :  { %p296_p4 = pnand %p295_p3, %p289_p0 }
   0xb   :  { %299 = shalt.err (!%p296_p4)
}
   0xc   :  { %s347_s21 = smov 128   ;;  %s348_s22 = smov 8  }
   0xd   :  { %24 = dma.hbm_to_vmem [thread:$0]  %s408_s0, 256, %s19_s19, [#allocation3], %s347_s21, %s347_s21, %s348_s22  }
   0xe   :  { %s349_s25 = smov [#allocation5]  }
   0xf   :  { %s30_s26 = sshll.u32 %s349_s25, 4  ;;  %s31_s26 = int_to_ptr.vmem [resolvable:$true] %s30_s26 }
  0x10   :  { %s308_s27 = scalar_lea.vmem %s31_s26, 2048  ;;  %p313_p6 = scmp.lt.s32.totalorder %s31_s26, %s31_s26 }
  0x11   :  { %p309_p5 = scmp.ne.s32.totalorder %s31_s26, %s308_s27  ;;  %p314_p7 = scmp.lt.s32.totalorder %s308_s27, %s308_s27 }
  0x13   :  { %p315_p8 = por %p314_p7, %p313_p6 }
  0x15   :  { %p316_p9 = pnand %p315_p8, %p309_p5 }
  0x17   :  { %319 = shalt.err (!%p316_p9)
}
  0x18   :  { %36 = dma.hbm_to_vmem [thread:$0]  %s409_s1, 2048, %s31_s26, [#allocation6], %s347_s21, %s347_s21, %s348_s22  }
  0x19   :  { %340 = dma.done.wait [#allocation3], 256  }
  0x1a   :  { %341 = vsyncadd [#allocation3], 4294967040 }
  0x1b   :  { %342 = dma.done.wait [#allocation6], 2048  }
  0x1c   :  { %343 = vsyncadd [#allocation6], 4294965248  ;;  %v66_v0 = vld [vmem:[#allocation5 + $0x78] sm:$0xff]  ;;  %v65_v1 = vld [vmem:[#allocation5 + $0x70] sm:$0xff]  ;;  %s350_s8 = smov [#allocation7]  }
  0x1d   :  { %236 = vmatprep.subr.mxu0 %v66_v0  ;;  %v64_v2 = vld [vmem:[#allocation5 + $0x68] sm:$0xff]  ;;  %v49_v3 = vld [vmem:[#allocation2] sm:$0xff]  ;;  %v63_v4 = vld [vmem:[#allocation5 + $0x60] sm:$0xff]  ;;  %s202_s9 = sshll.u32 %s350_s8, 4  ;;  %s203_s9 = int_to_ptr.vmem [resolvable:$true] %s202_s9 }
  0x1e   :  { %237 = vmatpush3.xpose.msra.mxu0 %v66_v0  ;;  %268 = vmatprep.mubr.f32.mxu0 %v49_v3  ;;  %v62_v5 = vld [vmem:[#allocation5 + $0x58] sm:$0xff]  ;;  %v61_v6 = vld [vmem:[#allocation5 + $0x50] sm:$0xff]  ;;  %v60_v7 = vld [vmem:[#allocation5 + $0x48] sm:$0xff]  ;;  %p325_p11 = scmp.lt.s32.totalorder %s203_s9, %s203_s9 }
  0x1f   :  { %238 = vmatprep.subr.mxu0 %v65_v1  ;;  %v59_v8 = vld [vmem:[#allocation5 + $0x40] sm:$0xff]  ;;  %v58_v9 = vld [vmem:[#allocation5 + $0x38] sm:$0xff]  ;;  %v57_v10 = vld [vmem:[#allocation5 + $0x30] sm:$0xff] }
  0x20   :  { %v56_v11 = vld [vmem:[#allocation5 + $0x28] sm:$0xff]  ;;  %v55_v12 = vld [vmem:[#allocation5 + $0x20] sm:$0xff]  ;;  %v54_v13 = vld [vmem:[#allocation5 + $0x18] sm:$0xff] }
  0x21   :  { %v53_v14 = vld [vmem:[#allocation5 + $0x10] sm:$0xff]  ;;  %v52_v15 = vld [vmem:[#allocation5 + $0x8] sm:$0xff]  ;;  %v51_v16 = vld [vmem:[#allocation5] sm:$0xff] }
  0x22   :  { %239 = vmatpush3.xpose.msra.mxu0 %v65_v1  ;;  %v50_v17 = vld [vmem:[#allocation2 + $0x8] sm:$0xff]  ;;  %v215_v19 = vld [vmem:[%s410_s2] ss:$0 sm:$0xff] }
  0x23   :  { %240 = vmatprep.subr.mxu0 %v64_v2  ;;  %v216_v41 = vld [vmem:[%s411_s3] ss:$0 sm:$0xff]  ;;  %s320_s3 = scalar_lea.vmem %s203_s9, 256 }
  0x24   :  { %v217_v45 = vld [vmem:[%s412_s4] ss:$0 sm:$0xff]  ;;  %p321_p10 = scmp.ne.s32.totalorder %s203_s9, %s320_s3  ;;  %p326_p12 = scmp.lt.s32.totalorder %s320_s3, %s320_s3 }
  0x26   :  { %241 = vmatpush3.xpose.msra.mxu0 %v64_v2  ;;  %p327_p13 = por %p326_p12, %p325_p11 }
  0x27   :  { %242 = vmatprep.subr.mxu0 %v63_v4 }
  0x28   :  { %p328_p0 = pnand %p327_p13, %p321_p10 }
  0x2a   :  { %243 = vmatpush3.xpose.msra.mxu0 %v63_v4 }
  0x2b   :  { %244 = vmatprep.subr.mxu0 %v62_v5 }
  0x2e   :  { %245 = vmatpush3.xpose.msra.mxu0 %v62_v5 }
  0x2f   :  { %246 = vmatprep.subr.mxu0 %v61_v6 }
  0x32   :  { %247 = vmatpush3.xpose.msra.mxu0 %v61_v6 }
  0x33   :  { %248 = vmatprep.subr.mxu0 %v60_v7 }
  0x36   :  { %249 = vmatpush3.xpose.msra.mxu0 %v60_v7 }
  0x37   :  { %250 = vmatprep.subr.mxu0 %v59_v8 }
  0x3a   :  { %251 = vmatpush3.xpose.msra.mxu0 %v59_v8 }
  0x3b   :  { %252 = vmatprep.subr.mxu0 %v58_v9 }
  0x3e   :  { %253 = vmatpush3.xpose.msra.mxu0 %v58_v9 }
  0x3f   :  { %254 = vmatprep.subr.mxu0 %v57_v10 }
  0x42   :  { %255 = vmatpush3.xpose.msra.mxu0 %v57_v10 }
  0x43   :  { %256 = vmatprep.subr.mxu0 %v56_v11 }
  0x46   :  { %257 = vmatpush3.xpose.msra.mxu0 %v56_v11 }
  0x47   :  { %258 = vmatprep.subr.mxu0 %v55_v12 }
  0x4a   :  { %259 = vmatpush3.xpose.msra.mxu0 %v55_v12 }
  0x4b   :  { %260 = vmatprep.subr.mxu0 %v54_v13 }
  0x4e   :  { %261 = vmatpush3.xpose.msra.mxu0 %v54_v13 }
  0x4f   :  { %262 = vmatprep.subr.mxu0 %v53_v14 }
  0x52   :  { %263 = vmatpush3.xpose.msra.mxu0 %v53_v14 }
  0x53   :  { %264 = vmatprep.subr.mxu0 %v52_v15 }
  0x56   :  { %265 = vmatpush3.xpose.msra.mxu0 %v52_v15 }
  0x57   :  { %266 = vmatprep.subr.mxu0 %v51_v16 }
  0x5a   :  { %267 = vmatpush3.xpose.msra.mxu0 %v51_v16 }
  0x5d   :  { %269 = vmatmul.mubr.f32.vlgmr.msra.gmra.mxu0 %v50_v17 }
 0x11d   :  { %v270_v18 = vpop.f32.mrf.mxu0 }
 0x11e   :  { %v146_v22 = vadd.f32 %v270_v18, %v215_v19 }
 0x11f   :  { %v140_v20 = vpop.f32.mrf.mxu0 }
 0x120   :  { %v141_v21 = vadd.f32 %v215_v19, %v140_v20  ;;  %v158_v24 = vmul.f32 %v146_v22, %v146_v22 }
 0x122   :  { %151 = vadd.xlane.f32.xlu0 %v141_v21  ;;  %v157_v23 = vmul.f32 %v141_v21, %v141_v21 }
 0x124   :  { %159 = vadd.xlane.f32.xlu1 %v157_v23 }
 0x126   :  { %153 = vadd.xlane.f32.xlu0 %v146_v22 }
 0x128   :  { %161 = vadd.xlane.f32.xlu1 %v158_v24 }
 0x1ab   :  { %v152_v25 = vpop.xlane.xlu0 %151 }
 0x1ac   :  { %v155_v26 = vmul.f32 0.03125, %v152_v25 }
 0x1ad   :  { %v160_v27 = vpop.xlane.xlu1 %159 }
 0x1ae   :  { %v165_v28 = vmul.f32 %v155_v26, %v155_v26  ;;  %v163_v29 = vmul.f32 0.03125, %v160_v27  ;;  %v175_v43 = vsub.f32 %v141_v21, %v155_v26 }
 0x1af   :  { %v154_v30 = vpop.xlane.xlu0 %153 }
 0x1b0   :  { %v167_v31 = vsub.f32 %v163_v29, %v165_v28  ;;  %v156_v32 = vmul.f32 0.03125, %v154_v30 }
 0x1b1   :  { %v162_v33 = vpop.xlane.xlu1 %161 }
 0x1b2   :  { %v169_v34 = vmax.f32 %v167_v31, 0.0  ;;  %v166_v35 = vmul.f32 %v156_v32, %v156_v32  ;;  %v164_v36 = vmul.f32 0.03125, %v162_v33  ;;  %v176_v48 = vsub.f32 %v146_v22, %v156_v32 }
 0x1b4   :  { %v171_v37 = vadd.f32 1e-05, %v169_v34  ;;  %v168_v38 = vsub.f32 %v164_v36, %v166_v35 }
 0x1b6   :  { %276 = vrsqrt.f32 %v171_v37  ;;  %v170_v39 = vmax.f32 %v168_v38, 0.0 }
 0x1b8   :  { %v172_v40 = vadd.f32 1e-05, %v170_v39 }
 0x1ba   :  { %278 = vrsqrt.f32 %v172_v40 }
 0x1c3   :  { %v277_v42 = vpop.eup %276 }
 0x1c4   :  { %v183_v44 = vmul.f32 %v277_v42, %v216_v41 }
 0x1c6   :  { %v185_v46 = vmul.f32 %v183_v44, %v175_v43 }
 0x1c7   :  { %v279_v47 = vpop.eup %278 }
 0x1c8   :  { %v184_v49 = vmul.f32 %v279_v47, %v216_v41  ;;  %v193_v50 = vadd.f32 %v217_v45, %v185_v46 }
 0x1ca   :  { %v186_v51 = vmul.f32 %v184_v49, %v176_v48  ;;  %195 = vst [vmem:[#allocation7] sm:$0xff] %v193_v50 }
 0x1cc   :  { %v194_v52 = vadd.f32 %v217_v45, %v186_v51 }
 0x1ce   :  { %196 = vst [vmem:[#allocation7 + $0x8] sm:$0xff] %v194_v52 }
 0x1cf   :  { %331 = shalt.err (!%p328_p0)
}
 0x1d0   :  { %208 = dma.vmem_to_hbm [thread:$0]  %s203_s9, 256, %s413_s5, [#allocation4], %s347_s21, %s347_s21, %s348_s22  }
 0x1d1   :  { %344 = dma.done.wait [#allocation4], 256  }
 0x1d2   :  { %345 = vsyncadd [#allocation4], 4294967040 }
 0x1d3   :  { %212 = vsyncpa [#allocation3], 1 }
 0x1d4   :  { %213 = vsyncpa [#allocation6], 1 }
 0x1d5   :  { %214 = vsyncpa [#allocation4], 1 }

// kernel: tpu_custom_call.1
= control target key start
LH: loop header
LB: loop body
LE: loop exit
PB: predicated region body
PF: predicated region fallthrough
CT: control target
= control target key end

     0   :  { %10 = vsyncpa [#allocation3], 0  ;;  %s408_s0 = inlined_call_operand.hbm [shape: f32[16,128], index: 0, kind: input, shape index: {}]   ;;  %s409_s1 = inlined_call_operand.hbm [shape: f32[128,128], index: 1, kind: input, shape index: {}]   ;;  %s410_s2 = inlined_call_operand.vmem [shape: f32[1,128], index: 2, kind: input, shape index: {}]   ;;  %s411_s3 = inlined_call_operand.vmem [shape: f32[1,128], index: 3, kind: input, shape index: {}]   ;;  %s412_s4 = inlined_call_operand.vmem [shape: f32[1,128], index: 4, kind: input, shape index: {}]   ;;  %s413_s5 = inlined_call_operand.hbm [shape: f32[16,128], index: 5, kind: output, shape index: {}]  }
   0x1   :  { %11 = vsyncpa [#allocation6], 0 }
   0x2   :  { %12 = vsyncpa [#allocation4], 0  ;;  %s346_s18 = smov [#allocation2]  }
   0x3   :  { %s18_s19 = sshll.u32 %s346_s18, 4  ;;  %s19_s19 = int_to_ptr.vmem [resolvable:$true] %s18_s19 }
   0x4   :  { %s288_s20 = scalar_lea.vmem %s19_s19, 256  ;;  %p293_p1 = scmp.lt.s32.totalorder %s19_s19, %s19_s19 }
   0x5   :  { %p289_p0 = scmp.ne.s32.totalorder %s19_s19, %s288_s20  ;;  %p294_p2 = scmp.lt.s32.totalorder %s288_s20, %s288_s20 }
   0x7   :  { %p295_p3 = por %p294_p2, %p293_p1 }
   0x9   :  { %p296_p4 = pnand %p295_p3, %p289_p0 }
   0xb   :  { %299 = shalt.err (!%p296_p4)
}
   0xc   :  { %s347_s21 = smov 128   ;;  %s348_s22 = smov 8  }
   0xd   :  { %24 = dma.hbm_to_vmem [thread:$0]  %s408_s0, 256, %s19_s19, [#allocation3], %s347_s21, %s347_s21, %s348_s22  }
   0xe   :  { %s349_s25 = smov [#allocation5]  }
   0xf   :  { %s30_s26 = sshll.u32 %s349_s25, 4  ;;  %s31_s26 = int_to_ptr.vmem [resolvable:$true] %s30_s26 }
  0x10   :  { %s308_s27 = scalar_lea.vmem %s31_s26, 2048  ;;  %p313_p6 = scmp.lt.s32.totalorder %s31_s26, %s31_s26 }
  0x11   :  { %p309_p5 = scmp.ne.s32.totalorder %s31_s26, %s308_s27  ;;  %p314_p7 = scmp.lt.s32.totalorder %s308_s27, %s308_s27 }
  0x13   :  { %p315_p8 = por %p314_p7, %p313_p6 }
  0x15   :  { %p316_p9 = pnand %p315_p8, %p309_p5 }
  0x17   :  { %319 = shalt.err (!%p316_p9)
}
  0x18   :  { %36 = dma.hbm_to_vmem [thread:$0]  %s409_s1, 2048, %s31_s26, [#allocation6], %s347_s21, %s347_s21, %s348_s22  }
  0x19   :  { %340 = dma.done.wait [#allocation3], 256  }
  0x1a   :  { %341 = vsyncadd [#allocation3], 4294967040 }
  0x1b   :  { %342 = dma.done.wait [#allocation6], 2048  }
  0x1c   :  { %343 = vsyncadd [#allocation6], 4294965248  ;;  %v66_v0 = vld [vmem:[#allocation5 + $0x78] sm:$0xff]  ;;  %v65_v1 = vld [vmem:[#allocation5 + $0x70] sm:$0xff]  ;;  %s350_s8 = smov [#allocation7]  }
  0x1d   :  { %236 = vmatprep.subr.mxu0 %v66_v0  ;;  %v64_v2 = vld [vmem:[#allocation5 + $0x68] sm:$0xff]  ;;  %v49_v3 = vld [vmem:[#allocation2] sm:$0xff]  ;;  %v63_v4 = vld [vmem:[#allocation5 + $0x60] sm:$0xff]  ;;  %s202_s9 = sshll.u32 %s350_s8, 4  ;;  %s203_s9 = int_to_ptr.vmem [resolvable:$true] %s202_s9 }
  0x1e   :  { %237 = vmatpush3.xpose.msra.mxu0 %v66_v0  ;;  %268 = vmatprep.mubr.f32.mxu0 %v49_v3  ;;  %v62_v5 = vld [vmem:[#allocation5 + $0x58] sm:$0xff]  ;;  %v61_v6 = vld [vmem:[#allocation5 + $0x50] sm:$0xff]  ;;  %v60_v7 = vld [vmem:[#allocation5 + $0x48] sm:$0xff]  ;;  %p325_p11 = scmp.lt.s32.totalorder %s203_s9, %s203_s9 }
  0x1f   :  { %238 = vmatprep.subr.mxu0 %v65_v1  ;;  %v59_v8 = vld [vmem:[#allocation5 + $0x40] sm:$0xff]  ;;  %v58_v9 = vld [vmem:[#allocation5 + $0x38] sm:$0xff]  ;;  %v57_v10 = vld [vmem:[#allocation5 + $0x30] sm:$0xff] }
  0x20   :  { %v56_v11 = vld [vmem:[#allocation5 + $0x28] sm:$0xff]  ;;  %v55_v12 = vld [vmem:[#allocation5 + $0x20] sm:$0xff]  ;;  %v54_v13 = vld [vmem:[#allocation5 + $0x18] sm:$0xff] }
  0x21   :  { %v53_v14 = vld [vmem:[#allocation5 + $0x10] sm:$0xff]  ;;  %v52_v15 = vld [vmem:[#allocation5 + $0x8] sm:$0xff]  ;;  %v51_v16 = vld [vmem:[#allocation5] sm:$0xff] }
  0x22   :  { %239 = vmatpush3.xpose.msra.mxu0 %v65_v1  ;;  %v50_v17 = vld [vmem:[#allocation2 + $0x8] sm:$0xff]  ;;  %v215_v19 = vld [vmem:[%s410_s2] ss:$0 sm:$0xff] }
  0x23   :  { %240 = vmatprep.subr.mxu0 %v64_v2  ;;  %v216_v41 = vld [vmem:[%s411_s3] ss:$0 sm:$0xff]  ;;  %s320_s3 = scalar_lea.vmem %s203_s9, 256 }
  0x24   :  { %v217_v45 = vld [vmem:[%s412_s4] ss:$0 sm:$0xff]  ;;  %p321_p10 = scmp.ne.s32.totalorder %s203_s9, %s320_s3  ;;  %p326_p12 = scmp.lt.s32.totalorder %s320_s3, %s320_s3 }
  0x26   :  { %241 = vmatpush3.xpose.msra.mxu0 %v64_v2  ;;  %p327_p13 = por %p326_p12, %p325_p11 }
  0x27   :  { %242 = vmatprep.subr.mxu0 %v63_v4 }
  0x28   :  { %p328_p0 = pnand %p327_p13, %p321_p10 }
  0x2a   :  { %243 = vmatpush3.xpose.msra.mxu0 %v63_v4 }
  0x2b   :  { %244 = vmatprep.subr.mxu0 %v62_v5 }
  0x2e   :  { %245 = vmatpush3.xpose.msra.mxu0 %v62_v5 }
  0x2f   :  { %246 = vmatprep.subr.mxu0 %v61_v6 }
  0x32   :  { %247 = vmatpush3.xpose.msra.mxu0 %v61_v6 }
  0x33   :  { %248 = vmatprep.subr.mxu0 %v60_v7 }
  0x36   :  { %249 = vmatpush3.xpose.msra.mxu0 %v60_v7 }
  0x37   :  { %250 = vmatprep.subr.mxu0 %v59_v8 }
  0x3a   :  { %251 = vmatpush3.xpose.msra.mxu0 %v59_v8 }
  0x3b   :  { %252 = vmatprep.subr.mxu0 %v58_v9 }
  0x3e   :  { %253 = vmatpush3.xpose.msra.mxu0 %v58_v9 }
  0x3f   :  { %254 = vmatprep.subr.mxu0 %v57_v10 }
  0x42   :  { %255 = vmatpush3.xpose.msra.mxu0 %v57_v10 }
  0x43   :  { %256 = vmatprep.subr.mxu0 %v56_v11 }
  0x46   :  { %257 = vmatpush3.xpose.msra.mxu0 %v56_v11 }
  0x47   :  { %258 = vmatprep.subr.mxu0 %v55_v12 }
  0x4a   :  { %259 = vmatpush3.xpose.msra.mxu0 %v55_v12 }
  0x4b   :  { %260 = vmatprep.subr.mxu0 %v54_v13 }
  0x4e   :  { %261 = vmatpush3.xpose.msra.mxu0 %v54_v13 }
  0x4f   :  { %262 = vmatprep.subr.mxu0 %v53_v14 }
  0x52   :  { %263 = vmatpush3.xpose.msra.mxu0 %v53_v14 }
  0x53   :  { %264 = vmatprep.subr.mxu0 %v52_v15 }
  0x56   :  { %265 = vmatpush3.xpose.msra.mxu0 %v52_v15 }
  0x57   :  { %266 = vmatprep.subr.mxu0 %v51_v16 }
  0x5a   :  { %267 = vmatpush3.xpose.msra.mxu0 %v51_v16 }
  0x5d   :  { %269 = vmatmul.mubr.f32.vlgmr.msra.gmra.mxu0 %v50_v17 }
 0x11d   :  { %v270_v18 = vpop.f32.mrf.mxu0 }
 0x11e   :  { %v146_v22 = vadd.f32 %v270_v18, %v215_v19 }
 0x11f   :  { %v140_v20 = vpop.f32.mrf.mxu0 }
 0x120   :  { %v141_v21 = vadd.f32 %v215_v19, %v140_v20  ;;  %v158_v24 = vmul.f32 %v146_v22, %v146_v22 }
 0x122   :  { %151 = vadd.xlane.f32.xlu0 %v141_v21  ;;  %v157_v23 = vmul.f32 %v141_v21, %v141_v21 }
 0x124   :  { %159 = vadd.xlane.f32.xlu1 %v157_v23 }
 0x126   :  { %153 = vadd.xlane.f32.xlu0 %v146_v22 }
 0x128   :  { %161 = vadd.xlane.f32.xlu1 %v158_v24 }
 0x1ab   :  { %v152_v25 = vpop.xlane.xlu0 %151 }
 0x1ac   :  { %v155_v26 = vmul.f32 0.03125, %v152_v25 }
 0x1ad   :  { %v160_v27 = vpop.xlane.xlu1 %159 }
 0x1ae   :  { %v165_v28 = vmul.f32 %v155_v26, %v155_v26  ;;  %v163_v29 = vmul.f32 0.03125, %v160_v27  ;;  %v175_v43 = vsub.f32 %v141_v21, %v155_v26 }
 0x1af   :  { %v154_v30 = vpop.xlane.xlu0 %153 }
 0x1b0   :  { %v167_v31 = vsub.f32 %v163_v29, %v165_v28  ;;  %v156_v32 = vmul.f32 0.03125, %v154_v30 }
 0x1b1   :  { %v162_v33 = vpop.xlane.xlu1 %161 }
 0x1b2   :  { %v169_v34 = vmax.f32 %v167_v31, 0.0  ;;  %v166_v35 = vmul.f32 %v156_v32, %v156_v32  ;;  %v164_v36 = vmul.f32 0.03125, %v162_v33  ;;  %v176_v48 = vsub.f32 %v146_v22, %v156_v32 }
 0x1b4   :  { %v171_v37 = vadd.f32 1e-05, %v169_v34  ;;  %v168_v38 = vsub.f32 %v164_v36, %v166_v35 }
 0x1b6   :  { %276 = vrsqrt.f32 %v171_v37  ;;  %v170_v39 = vmax.f32 %v168_v38, 0.0 }
 0x1b8   :  { %v172_v40 = vadd.f32 1e-05, %v170_v39 }
 0x1ba   :  { %278 = vrsqrt.f32 %v172_v40 }
 0x1c3   :  { %v277_v42 = vpop.eup %276 }
 0x1c4   :  { %v183_v44 = vmul.f32 %v277_v42, %v216_v41 }
 0x1c6   :  { %v185_v46 = vmul.f32 %v183_v44, %v175_v43 }
 0x1c7   :  { %v279_v47 = vpop.eup %278 }
 0x1c8   :  { %v184_v49 = vmul.f32 %v279_v47, %v216_v41  ;;  %v193_v50 = vadd.f32 %v217_v45, %v185_v46 }
 0x1ca   :  { %v186_v51 = vmul.f32 %v184_v49, %v176_v48  ;;  %195 = vst [vmem:[#allocation7] sm:$0xff] %v193_v50 }
 0x1cc   :  { %v194_v52 = vadd.f32 %v217_v45, %v186_v51 }
 0x1ce   :  { %196 = vst [vmem:[#allocation7 + $0x8] sm:$0xff] %v194_v52 }
 0x1cf   :  { %331 = shalt.err (!%p328_p0)
}
 0x1d0   :  { %208 = dma.vmem_to_hbm [thread:$0]  %s203_s9, 256, %s413_s5, [#allocation4], %s347_s21, %s347_s21, %s348_s22  }
 0x1d1   :  { %344 = dma.done.wait [#allocation4], 256  }
 0x1d2   :  { %345 = vsyncadd [#allocation4], 4294967040 }
 0x1d3   :  { %212 = vsyncpa [#allocation3], 1 }
 0x1d4   :  { %213 = vsyncpa [#allocation6], 1 }
 0x1d5   :  { %214 = vsyncpa [#allocation4], 1 }

</bundles_post_ra>
